<compile_context>
chip_gen: v7x
topology: tpu7x:2x2x1
jax: 0.10.0
libtpu: 0.0.40
codegen_flags: <defaults>
</compile_context>

<pallas_src>
import functools

import jax
import jax.numpy as jnp
from jax.experimental import pallas as pl
from jax.experimental.pallas import tpu as pltpu


def _static_pow(x, p):
    """Trace-time specialized power: identity for p==1, multiply chain for integer p."""
    p = float(p)
    if p == 1.0:
        return x
    if p.is_integer() and p > 0:
        n = int(p)
        result = None
        base = x
        while n:
            if n & 1:
                result = base if result is None else result * base
            n >>= 1
            if n:
                base = base * base
        return result
    return x ** p  # fallback: non-integer exponent (goes through exp/log on the EUP)


# ----------------------------------------------------------------------------
# Pallas kernel: the (B, M, A) hot path, tiled over anchors.
# ----------------------------------------------------------------------------
def _metrics_kernel(labels_ref, scores_ref, pboxes_t_ref, gboxes_ref, anc_t_ref,
                    align_ref, ovl_ref, ingts_ref, *, alpha, beta, eps):
    labels = labels_ref[0]           # (M, 1)   int32
    scores = scores_ref[0]           # (TA, C)  f32   (natural (anchor, class) layout)
    pboxes_t = pboxes_t_ref[0]       # (4, TA)  f32
    gboxes = gboxes_ref[0]           # (M, 4)   f32
    anc_t = anc_t_ref[...]           # (2, TA)  f32

    M = gboxes.shape[0]
    TA = scores.shape[0]
    C = scores.shape[1]

    # --- one-hot gather of per-gt class scores as an MXU matmul: (M,C) x (TA,C)^T -> (M,TA) ---
    # Contraction over C of both operands (Mosaic handles the transposed RHS on the MXU path),
    # so pd_scores needs no layout change outside the kernel.
    class_ids = jax.lax.broadcasted_iota(jnp.int32, (M, C), 1)
    onehot = (labels == class_ids).astype(jnp.float32)                      # (M, C)
    bbox_scores = jax.lax.dot_general(
        onehot, scores, (((1,), (1,)), ((), ())),
        preferred_element_type=jnp.float32)                                 # (M, TA) f32

    # gt coords: (M,1) columns; area computed at column width, broadcasts materialized once
    # for the coordinates that are reused (intersection + in_gts test).
    gx1c, gy1c = gboxes[:, 0:1], gboxes[:, 1:2]
    gx2c, gy2c = gboxes[:, 2:3], gboxes[:, 3:4]
    # spec's iou_calculator clips both areas — kept, but at narrow width (nearly free).
    area_g = jnp.maximum(gx2c - gx1c, 0.0) * jnp.maximum(gy2c - gy1c, 0.0)  # (M, 1)

    gx1 = jnp.broadcast_to(gx1c, (M, TA))
    gy1 = jnp.broadcast_to(gy1c, (M, TA))
    gx2 = jnp.broadcast_to(gx2c, (M, TA))
    gy2 = jnp.broadcast_to(gy2c, (M, TA))
    px1, py1 = pboxes_t[0:1, :], pboxes_t[1:2, :]                            # (1, TA)
    px2, py2 = pboxes_t[2:3, :], pboxes_t[3:4, :]
    area_p = jnp.maximum(px2 - px1, 0.0) * jnp.maximum(py2 - py1, 0.0)       # (1, TA)

    # --- plain IoU (matches the spec's iou_calculator) ---
    iw = jnp.maximum(jnp.minimum(gx2, px2) - jnp.maximum(gx1, px1), 0.0)     # (M, TA)
    ih = jnp.maximum(jnp.minimum(gy2, py2) - jnp.maximum(gy1, py1), 0.0)
    overlap = iw * ih
    union = (area_g + area_p) - overlap + eps                                # (M, TA)
    # EUP reciprocal (otherwise-idle slot).  approx=True perturbs IoU by a few ULPs; switch to
    # approx=False if bit-stable tie-breaking against the torch reference is required.
    iou = overlap * pl.reciprocal(union, approx=True)

    # align metric: alpha==1 -> no-op; beta=6 -> 3 VPU multiplies (no EUP log/exp chain).
    align = _static_pow(bbox_scores, alpha) * _static_pow(iou, beta)         # (M, TA)

    # select_candidates_in_gts: min(center - lt, rb - center) > eps
    ax, ay = anc_t[0:1, :], anc_t[1:2, :]
    dmin = jnp.minimum(jnp.minimum(ax - gx1, ay - gy1),
                       jnp.minimum(gx2 - ax, gy2 - ay))                      # (M, TA)

    align_ref[0] = align.astype(jnp.bfloat16)      # narrow writeback (feeds top-k / norm ratio)
    ovl_ref[0] = iou                               # f32: drives the discrete argmax assignment
    ingts_ref[0] = (dmin > eps).astype(jnp.int8)   # 1-byte mask plane


def _pick_anchor_tile(A_pad, M, C, requested=None):
    """VMEM-aware anchor-tile choice (A_pad is already a multiple of 128)."""
    if requested is not None:
        assert requested % 128 == 0 and A_pad % requested == 0, \
            "anchor_tile must be a multiple of 128 and divide the padded anchor count"
        return requested
    c_pad = -(-C // 128) * 128                     # scores tile pads its lane dim to 128
    per_col = (2 * (4 * c_pad + 4 * 4 + 2 * 4)     # double-buffered inputs per anchor column
               + 2 * M * (2 + 4 + 1)               # double-buffered outputs (bf16 + f32 + i8)
               + 12 * 4 * M)                       # live (M, TA) f32 intermediates (approx.)
    budget = 16 * 1024 * 1024                      # stay well inside v7x's default scoped VMEM
    ta = min(2048, A_pad, max(128, (budget // per_col) // 128 * 128))
    while A_pad % ta != 0:                         # terminates at 128 (A_pad % 128 == 0)
        ta -= 128
    return ta


def _compute_metrics(pd_scores, pd_bboxes, anc_points, gt_labels, gt_bboxes,
                     *, alpha, beta, eps, anchor_tile=None):
    B, A, C = pd_scores.shape
    M = gt_bboxes.shape[1]

    # Pad the anchor axis to a multiple of 128 so production anchor counts (e.g. 8400 -> 8448)
    # still tile / software-pipeline / megacore-shard; outputs are sliced back below.
    A_pad = -(-A // 128) * 128
    pad = A_pad - A
    if pad:
        pd_scores = jnp.pad(pd_scores, ((0, 0), (0, pad), (0, 0)))
        pd_bboxes = jnp.pad(pd_bboxes, ((0, 0), (0, pad), (0, 0)))
        anc_points = jnp.pad(anc_points, ((0, pad), (0, 0)))

    TA = _pick_anchor_tile(A_pad, M, C, anchor_tile)

    scores = pd_scores.astype(jnp.float32)                                # (B, A_pad, C) natural
    # pd_bboxes / anc_points transposes stay here: only 4 / 2 values per anchor (negligible
    # traffic) and they keep pred coords lane-resident without any in-kernel transpose.
    pboxes_t = jnp.transpose(pd_bboxes, (0, 2, 1)).astype(jnp.float32)    # (B, 4, A_pad)
    anc_t = jnp.transpose(anc_points, (1, 0)).astype(jnp.float32)         # (2, A_pad)
    labels_i = gt_labels.astype(jnp.int32)                                # (B, M, 1)
    gboxes = gt_bboxes.astype(jnp.float32)                                # (B, M, 4)

    kernel = functools.partial(_metrics_kernel, alpha=alpha, beta=beta, eps=eps)

    out_shape = (
        jax.ShapeDtypeStruct((B, M, A_pad), jnp.bfloat16),   # align_metric
        jax.ShapeDtypeStruct((B, M, A_pad), jnp.float32),    # overlaps (IoU)
        jax.ShapeDtypeStruct((B, M, A_pad), jnp.int8),       # mask_in_gts
    )
    grid_spec = pltpu.PrefetchScalarGridSpec(
        num_scalar_prefetch=0,
        grid=(B, A_pad // TA),
        in_specs=[
            pl.BlockSpec((1, M, 1), lambda b, t: (b, 0, 0)),    # gt_labels
            pl.BlockSpec((1, TA, C), lambda b, t: (b, t, 0)),   # pd_scores (natural layout)
            pl.BlockSpec((1, 4, TA), lambda b, t: (b, 0, t)),   # pd_bboxes^T
            pl.BlockSpec((1, M, 4), lambda b, t: (b, 0, 0)),    # gt_bboxes
            pl.BlockSpec((2, TA), lambda b, t: (0, t)),         # anc_points^T (shared)
        ],
        out_specs=[pl.BlockSpec((1, M, TA), lambda b, t: (b, 0, t)) for _ in range(3)],
    )
    align, ovl, ingts = pl.pallas_call(
        kernel,
        out_shape=out_shape,
        grid_spec=grid_spec,
        compiler_params=pltpu.CompilerParams(
            dimension_semantics=("parallel", "parallel"),
            vmem_limit_bytes=48 * 1024 * 1024),   # < 64 MiB physical on v7x, plenty on v5e/v6e
    )(labels_i, scores, pboxes_t, gboxes, anc_t)
    return align[..., :A], ovl[..., :A], ingts[..., :A]


# ----------------------------------------------------------------------------
# Full forward (matches TaskAlignedAssigner.forward semantics)
# ----------------------------------------------------------------------------
def task_aligned_assigner(pd_scores, pd_bboxes, anc_points, gt_labels, gt_bboxes,
                          mask_gt, *, topk=13, num_classes=20, alpha=1.0, beta=6.0,
                          eps=1e-9, anchor_tile=None):
    B, A, C = pd_scores.shape
    M = gt_bboxes.shape[1]

    if M == 0:  # static early-out, mirrors the torch n_max_boxes == 0 branch
        return (jnp.full((B, A), num_classes, jnp.int32),
                jnp.zeros_like(pd_bboxes),
                jnp.zeros((B, A, num_classes), jnp.float32),
                jnp.zeros((B, A), jnp.bool_))

    # --- hot path: Pallas kernel ---
    align_bf16, overlaps, ingts_i8 = _compute_metrics(
        pd_scores, pd_bboxes, anc_points, gt_labels, gt_bboxes,
        alpha=alpha, beta=beta, eps=eps, anchor_tile=anchor_tile)
    mask_in_gts = ingts_i8.astype(jnp.float32)              # (B, M, A) 0/1
    mask_gt_f = mask_gt.astype(jnp.float32)                 # (B, M, 1)

    # --- select_topk_candidates (data-dependent: plain JAX glue) ---
    # top-k operand = align * in_gts; the select fuses into top_k's input (no extra plane).
    metrics = jnp.where(ingts_i8 > 0, align_bf16, jnp.zeros_like(align_bf16))
    _, topk_idxs = jax.lax.top_k(metrics, topk)             # (B, M, topk)
    topk_mask = jnp.broadcast_to(mask_gt_f > 0, topk_idxs.shape)
    topk_idxs = jnp.where(topk_mask, topk_idxs, 0)
    # occurrence counts via scatter-add (avoids the (B, M, topk, A) one-hot intermediate)
    b_ix = jnp.arange(B, dtype=jnp.int32)[:, None, None]
    m_ix = jnp.arange(M, dtype=jnp.int32)[None, :, None]
    counts = jnp.zeros((B, M, A), jnp.int32).at[b_ix, m_ix, topk_idxs].add(1)
    is_in_topk = jnp.where(counts > 1, 0, counts).astype(jnp.float32)        # (B, M, A)
    mask_pos = is_in_topk * mask_in_gts * mask_gt_f                          # (B, M, A)

    # --- select_highest_overlaps ---
    # TODO(synk): the argmax over M could be folded into the kernel epilogue (idle XLU) to save
    # this extra (B, M, A) read; kept in glue for now (lower priority per review).
    fg_mask = jnp.sum(mask_pos, axis=-2)                    # (B, A)
    mask_multi_gts = jnp.broadcast_to(fg_mask[:, None, :] > 1, mask_pos.shape)
    max_overlaps_idx = jnp.argmax(overlaps, axis=1)         # (B, A)
    is_max_overlaps = (jnp.arange(M, dtype=max_overlaps_idx.dtype)[None, :, None]
                       == max_overlaps_idx[:, None, :]).astype(jnp.float32)  # (B, M, A)
    mask_pos = jnp.where(mask_multi_gts, is_max_overlaps, mask_pos)
    fg_mask = jnp.sum(mask_pos, axis=-2)
    target_gt_idx = jnp.argmax(mask_pos, axis=-2)           # (B, A)

    # --- get_targets ---
    batch_ind = jnp.arange(B, dtype=jnp.int32)[:, None]
    flat_idx = target_gt_idx + batch_ind * M                # (B, A)
    target_labels = gt_labels.astype(jnp.int32).reshape(-1)[flat_idx]   # (B, A)
    target_bboxes = gt_bboxes.reshape(-1, 4)[flat_idx]                  # (B, A, 4)
    target_labels = jnp.where(target_labels < 0, 0, target_labels)
    target_scores = jax.nn.one_hot(target_labels, num_classes, dtype=jnp.float32)
    fg_scores_mask = jnp.broadcast_to(fg_mask[:, :, None], target_scores.shape)
    target_scores = jnp.where(fg_scores_mask > 0, target_scores, 0.0)

    # --- normalization of target scores ---
    align_metric = align_bf16.astype(jnp.float32) * mask_pos
    pos_align_metrics = jnp.max(align_metric, axis=-1, keepdims=True)        # (B, M, 1)
    pos_overlaps = jnp.max(overlaps * mask_pos, axis=-1, keepdims=True)      # (B, M, 1)
    norm_align_metric = jnp.max(
        align_metric * pos_overlaps / (pos_align_metrics + eps), axis=-2)[..., None]  # (B, A, 1)
    target_scores = target_scores * norm_align_metric

    return target_labels, target_bboxes, target_scores, fg_mask.astype(jnp.bool_)


if __name__ == "__main__":
    key = jax.random.PRNGKey(0)
    B, C, M = 2, 20, 8
    GRID = 14                      # 14x14 -> 196 anchors: exercises the pad-to-128 path (196 -> 256)
    A = GRID * GRID
    TOPK = 13

    k = jax.random.split(key, 6)

    # anchor centers on a GRIDxGRID unit-stride grid
    xs = jnp.arange(GRID, dtype=jnp.float32) + 0.5
    gx, gy = jnp.meshgrid(xs, xs, indexing="ij")
    anc_points = jnp.stack([gx.reshape(-1), gy.reshape(-1)], axis=-1)        # (A, 2)

    pd_scores = jax.random.uniform(k[0], (B, A, C), jnp.float32)             # (B, A, C)

    p_xy = jax.random.uniform(k[1], (B, A, 2), jnp.float32) * 10.0
    p_wh = jax.random.uniform(k[2], (B, A, 2), jnp.float32) * 4.0 + 1.0
    pd_bboxes = jnp.concatenate([p_xy, p_xy + p_wh], axis=-1)                # (B, A, 4) xyxy

    g_xy = jax.random.uniform(k[3], (B, M, 2), jnp.float32) * 8.0
    g_wh = jax.random.uniform(k[4], (B, M, 2), jnp.float32) * 5.0 + 2.0
    gt_bboxes = jnp.concatenate([g_xy, g_xy + g_wh], axis=-1)                # (B, M, 4) xyxy

    gt_labels = jax.random.randint(k[5], (B, M, 1), 0, C, jnp.int32)         # (B, M, 1)
    mask_gt = (jnp.arange(M) < 6).astype(jnp.float32)[None, :, None]
    mask_gt = jnp.broadcast_to(mask_gt, (B, M, 1))                           # (B, M, 1)

    # anchor_tile=128 -> padded A=256, grid=(B, 2): exercises padding + the two-axis pipeline.
    fwd = jax.jit(functools.partial(task_aligned_assigner,
                                    topk=TOPK, num_classes=C,
                                    alpha=1.0, beta=6.0, eps=1e-9,
                                    anchor_tile=128))
    tl, tb, ts, fg = fwd(pd_scores, pd_bboxes, anc_points, gt_labels, gt_bboxes, mask_gt)
    jax.block_until_ready((tl, tb, ts, fg))

    assert tl.shape == (B, A)
    assert tb.shape == (B, A, 4)
    assert ts.shape == (B, A, C)
    assert fg.shape == (B, A)
    assert bool(jnp.all(jnp.isfinite(ts)))

    print("KERNEL_OK")
</pallas_src>

<mosaic_0001>
module attributes {stable_mosaic.version = 11 : i64} {
  func.func private @main(%arg0: i32) attributes {dimension_semantics = [#tpu.dimension_semantics<core_parallel>], iteration_bounds = array<i64: 2>, tpu.core_type = #tpu.core_type<sc_scalar_subcore>, window_params = []} {
    return
  }
}

module attributes {stable_mosaic.version = 11 : i64} {
  func.func private @main(%arg0: i32) attributes {dimension_semantics = [#tpu.dimension_semantics<core_parallel>], iteration_bounds = array<i64: 2>, tpu.core_type = #tpu.core_type<sc_scalar_subcore>, window_params = []} {
    return
  }
}

module attributes {stable_mosaic.version = 11 : i64} {
  func.func @_metrics_kernel(%arg0: i32, %arg1: i32, %arg2: memref<1x8x1xi32, #tpu.memory_space<vmem>>, %arg3: memref<1x128x20xf32, #tpu.memory_space<vmem>>, %arg4: memref<1x4x128xf32, #tpu.memory_space<vmem>>, %arg5: memref<1x8x4xf32, #tpu.memory_space<vmem>>, %arg6: memref<2x128xf32, #tpu.memory_space<vmem>>, %arg7: memref<1x8x128xbf16, #tpu.memory_space<vmem>>, %arg8: memref<1x8x128xf32, #tpu.memory_space<vmem>>, %arg9: memref<1x8x128xi8, #tpu.memory_space<vmem>>) attributes {dimension_semantics = [#tpu.dimension_semantics<parallel>, #tpu.dimension_semantics<parallel>], iteration_bounds = array<i64: 2, 2>, scalar_prefetch = 0 : i64, scratch_operands = 0 : i64, tpu.core_type = #tpu.core_type<tc>, window_params = [{transform_indices = @transform_0, window_bounds = array<i64: 1, 8, 1>}, {transform_indices = @transform_1, window_bounds = array<i64: 1, 128, 20>}, {transform_indices = @transform_2, window_bounds = array<i64: 1, 4, 128>}, {transform_indices = @transform_3, window_bounds = array<i64: 1, 8, 4>}, {transform_indices = @transform_4, window_bounds = array<i64: 2, 128>}, {transform_indices = @transform_5, window_bounds = array<i64: 1, 8, 128>}, {transform_indices = @transform_6, window_bounds = array<i64: 1, 8, 128>}, {transform_indices = @transform_7, window_bounds = array<i64: 1, 8, 128>}]} {
    %c0 = arith.constant 0 : index
    %c0_0 = arith.constant 0 : index
    %c0_1 = arith.constant 0 : index
    %0 = vector.load %arg2[%c0, %c0_0, %c0_1] : memref<1x8x1xi32, #tpu.memory_space<vmem>>, vector<1x8x1xi32>
    %1 = vector.shape_cast %0 : vector<1x8x1xi32> to vector<8x1xi32>
    %c0_2 = arith.constant 0 : index
    %c0_3 = arith.constant 0 : index
    %c0_4 = arith.constant 0 : index
    %2 = vector.load %arg3[%c0_2, %c0_3, %c0_4] : memref<1x128x20xf32, #tpu.memory_space<vmem>>, vector<1x128x20xf32>
    %3 = vector.shape_cast %2 : vector<1x128x20xf32> to vector<128x20xf32>
    %c0_5 = arith.constant 0 : index
    %c0_6 = arith.constant 0 : index
    %c0_7 = arith.constant 0 : index
    %4 = vector.load %arg4[%c0_5, %c0_6, %c0_7] : memref<1x4x128xf32, #tpu.memory_space<vmem>>, vector<1x4x128xf32>
    %5 = vector.shape_cast %4 : vector<1x4x128xf32> to vector<4x128xf32>
    %c0_8 = arith.constant 0 : index
    %c0_9 = arith.constant 0 : index
    %c0_10 = arith.constant 0 : index
    %6 = vector.load %arg5[%c0_8, %c0_9, %c0_10] : memref<1x8x4xf32, #tpu.memory_space<vmem>>, vector<1x8x4xf32>
    %7 = vector.shape_cast %6 : vector<1x8x4xf32> to vector<8x4xf32>
    %c0_11 = arith.constant 0 : index
    %c0_12 = arith.constant 0 : index
    %8 = vector.load %arg6[%c0_11, %c0_12] : memref<2x128xf32, #tpu.memory_space<vmem>>, vector<2x128xf32>
    %9 = tpu.iota {dimensions = array<i32: 1>} : vector<8x20xi32>
    %10 = vector.broadcast %1 : vector<8x1xi32> to vector<8x20xi32>
    %11 = arith.cmpi eq, %10, %9 : vector<8x20xi32>
    %12 = arith.extui %11 : vector<8x20xi1> to vector<8x20xi32>
    %13 = arith.sitofp %12 : vector<8x20xi32> to vector<8x20xf32>
    %cst = arith.constant dense<0.000000e+00> : vector<8x128xf32>
    %14 = tpu.matmul %13, %3, %cst {dimension_numbers = #tpu.dot_dimension_numbers<[1], [1], [0], [0], [0, 0, 1, 0], [], []>} : vector<8x20xf32>, vector<128x20xf32>, vector<8x128xf32> -> vector<8x128xf32>
    %15 = vector.extract_strided_slice %7 {offsets = [0, 0], sizes = [8, 1], strides = [1, 1]} : vector<8x4xf32> to vector<8x1xf32>
    %16 = vector.extract_strided_slice %7 {offsets = [0, 1], sizes = [8, 1], strides = [1, 1]} : vector<8x4xf32> to vector<8x1xf32>
    %17 = vector.extract_strided_slice %7 {offsets = [0, 2], sizes = [8, 1], strides = [1, 1]} : vector<8x4xf32> to vector<8x1xf32>
    %18 = vector.extract_strided_slice %7 {offsets = [0, 3], sizes = [8, 1], strides = [1, 1]} : vector<8x4xf32> to vector<8x1xf32>
    %19 = arith.subf %17, %15 : vector<8x1xf32>
    %cst_13 = arith.constant 0.000000e+00 : f32
    %20 = vector.broadcast %cst_13 : f32 to vector<8x1xf32>
    %21 = arith.maximumf %19, %20 : vector<8x1xf32>
    %22 = arith.subf %18, %16 : vector<8x1xf32>
    %cst_14 = arith.constant 0.000000e+00 : f32
    %23 = vector.broadcast %cst_14 : f32 to vector<8x1xf32>
    %24 = arith.maximumf %22, %23 : vector<8x1xf32>
    %25 = arith.mulf %21, %24 : vector<8x1xf32>
    %26 = vector.shape_cast %15 : vector<8x1xf32> to vector<8x1xf32>
    %27 = vector.broadcast %26 : vector<8x1xf32> to vector<8x128xf32>
    %28 = vector.shape_cast %16 : vector<8x1xf32> to vector<8x1xf32>
    %29 = vector.broadcast %28 : vector<8x1xf32> to vector<8x128xf32>
    %30 = vector.shape_cast %17 : vector<8x1xf32> to vector<8x1xf32>
    %31 = vector.broadcast %30 : vector<8x1xf32> to vector<8x128xf32>
    %32 = vector.shape_cast %18 : vector<8x1xf32> to vector<8x1xf32>
    %33 = vector.broadcast %32 : vector<8x1xf32> to vector<8x128xf32>
    %34 = vector.extract_strided_slice %5 {offsets = [0, 0], sizes = [1, 128], strides = [1, 1]} : vector<4x128xf32> to vector<1x128xf32>
    %35 = vector.extract_strided_slice %5 {offsets = [1, 0], sizes = [1, 128], strides = [1, 1]} : vector<4x128xf32> to vector<1x128xf32>
    %36 = vector.extract_strided_slice %5 {offsets = [2, 0], sizes = [1, 128], strides = [1, 1]} : vector<4x128xf32> to vector<1x128xf32>
    %37 = vector.extract_strided_slice %5 {offsets = [3, 0], sizes = [1, 128], strides = [1, 1]} : vector<4x128xf32> to vector<1x128xf32>
    %38 = arith.subf %36, %34 : vector<1x128xf32>
    %cst_15 = arith.constant 0.000000e+00 : f32
    %39 = vector.broadcast %cst_15 : f32 to vector<1x128xf32>
    %40 = arith.maximumf %38, %39 : vector<1x128xf32>
    %41 = arith.subf %37, %35 : vector<1x128xf32>
    %cst_16 = arith.constant 0.000000e+00 : f32
    %42 = vector.broadcast %cst_16 : f32 to vector<1x128xf32>
    %43 = arith.maximumf %41, %42 : vector<1x128xf32>
    %44 = arith.mulf %40, %43 : vector<1x128xf32>
    %45 = vector.broadcast %36 : vector<1x128xf32> to vector<8x128xf32>
    %46 = arith.minimumf %31, %45 : vector<8x128xf32>
    %47 = vector.broadcast %34 : vector<1x128xf32> to vector<8x128xf32>
    %48 = arith.maximumf %27, %47 : vector<8x128xf32>
    %49 = arith.subf %46, %48 : vector<8x128xf32>
    %cst_17 = arith.constant 0.000000e+00 : f32
    %50 = vector.broadcast %cst_17 : f32 to vector<8x128xf32>
    %51 = arith.maximumf %49, %50 : vector<8x128xf32>
    %52 = vector.broadcast %37 : vector<1x128xf32> to vector<8x128xf32>
    %53 = arith.minimumf %33, %52 : vector<8x128xf32>
    %54 = vector.broadcast %35 : vector<1x128xf32> to vector<8x128xf32>
    %55 = arith.maximumf %29, %54 : vector<8x128xf32>
    %56 = arith.subf %53, %55 : vector<8x128xf32>
    %cst_18 = arith.constant 0.000000e+00 : f32
    %57 = vector.broadcast %cst_18 : f32 to vector<8x128xf32>
    %58 = arith.maximumf %56, %57 : vector<8x128xf32>
    %59 = arith.mulf %51, %58 : vector<8x128xf32>
    %60 = vector.broadcast %25 : vector<8x1xf32> to vector<8x128xf32>
    %61 = vector.broadcast %44 : vector<1x128xf32> to vector<8x128xf32>
    %62 = arith.addf %60, %61 : vector<8x128xf32>
    %63 = arith.subf %62, %59 : vector<8x128xf32>
    %cst_19 = arith.constant 9.99999971E-10 : f32
    %64 = vector.broadcast %cst_19 : f32 to vector<8x128xf32>
    %65 = arith.addf %63, %64 : vector<8x128xf32>
    %66 = tpu.reciprocal %65 {approx = true} : vector<8x128xf32> -> vector<8x128xf32>
    %67 = arith.mulf %59, %66 : vector<8x128xf32>
    %68 = arith.mulf %67, %67 : vector<8x128xf32>
    %69 = arith.mulf %68, %68 : vector<8x128xf32>
    %70 = arith.mulf %68, %69 : vector<8x128xf32>
    %71 = arith.mulf %14, %70 : vector<8x128xf32>
    %72 = vector.extract_strided_slice %8 {offsets = [0, 0], sizes = [1, 128], strides = [1, 1]} : vector<2x128xf32> to vector<1x128xf32>
    %73 = vector.extract_strided_slice %8 {offsets = [1, 0], sizes = [1, 128], strides = [1, 1]} : vector<2x128xf32> to vector<1x128xf32>
    %74 = vector.broadcast %72 : vector<1x128xf32> to vector<8x128xf32>
    %75 = arith.subf %74, %27 : vector<8x128xf32>
    %76 = vector.broadcast %73 : vector<1x128xf32> to vector<8x128xf32>
    %77 = arith.subf %76, %29 : vector<8x128xf32>
    %78 = arith.minimumf %75, %77 : vector<8x128xf32>
    %79 = vector.broadcast %72 : vector<1x128xf32> to vector<8x128xf32>
    %80 = arith.subf %31, %79 : vector<8x128xf32>
    %81 = vector.broadcast %73 : vector<1x128xf32> to vector<8x128xf32>
    %82 = arith.subf %33, %81 : vector<8x128xf32>
    %83 = arith.minimumf %80, %82 : vector<8x128xf32>
    %84 = arith.minimumf %78, %83 : vector<8x128xf32>
    %85 = arith.truncf %71 : vector<8x128xf32> to vector<8x128xbf16>
    %c0_20 = arith.constant 0 : index
    %c0_21 = arith.constant 0 : index
    %c0_22 = arith.constant 0 : index
    %86 = vector.load %arg7[%c0_20, %c0_21, %c0_22] : memref<1x8x128xbf16, #tpu.memory_space<vmem>>, vector<1x8x128xbf16>
    %87 = vector.shape_cast %86 : vector<1x8x128xbf16> to vector<8x128xbf16>
    %88 = vector.shape_cast %85 : vector<8x128xbf16> to vector<1x8x128xbf16>
    tpu.vector_store %arg7[%c0_20, %c0_21, %c0_22], %88 {strides = array<i32>} : memref<1x8x128xbf16, #tpu.memory_space<vmem>>, vector<1x8x128xbf16>,
    %c0_23 = arith.constant 0 : index
    %c0_24 = arith.constant 0 : index
    %c0_25 = arith.constant 0 : index
    %89 = vector.load %arg8[%c0_23, %c0_24, %c0_25] : memref<1x8x128xf32, #tpu.memory_space<vmem>>, vector<1x8x128xf32>
    %90 = vector.shape_cast %89 : vector<1x8x128xf32> to vector<8x128xf32>
    %91 = vector.shape_cast %67 : vector<8x128xf32> to vector<1x8x128xf32>
    tpu.vector_store %arg8[%c0_23, %c0_24, %c0_25], %91 {strides = array<i32>} : memref<1x8x128xf32, #tpu.memory_space<vmem>>, vector<1x8x128xf32>,
    %cst_26 = arith.constant 9.99999971E-10 : f32
    %92 = vector.broadcast %cst_26 : f32 to vector<8x128xf32>
    %93 = arith.cmpf ogt, %84, %92 : vector<8x128xf32>
    %94 = arith.extui %93 : vector<8x128xi1> to vector<8x128xi8>
    %c0_27 = arith.constant 0 : index
    %c0_28 = arith.constant 0 : index
    %c0_29 = arith.constant 0 : index
    %95 = vector.load %arg9[%c0_27, %c0_28, %c0_29] : memref<1x8x128xi8, #tpu.memory_space<vmem>>, vector<1x8x128xi8>
    %96 = vector.shape_cast %95 : vector<1x8x128xi8> to vector<8x128xi8>
    %97 = vector.shape_cast %94 : vector<8x128xi8> to vector<1x8x128xi8>
    tpu.vector_store %arg9[%c0_27, %c0_28, %c0_29], %97 {strides = array<i32>} : memref<1x8x128xi8, #tpu.memory_space<vmem>>, vector<1x8x128xi8>,
    return
  }
  func.func @transform_0(%arg0: i32, %arg1: i32) -> (i32, i32, i32) {
    %c0_i32 = arith.constant 0 : i32
    %c0_i32_0 = arith.constant 0 : i32
    %c0_i32_1 = arith.constant 0 : i32
    return %arg0, %c0_i32, %c0_i32_0 : i32, i32, i32
  }
  func.func @transform_1(%arg0: i32, %arg1: i32) -> (i32, i32, i32) {
    %c0_i32 = arith.constant 0 : i32
    %c0_i32_0 = arith.constant 0 : i32
    return %arg0, %arg1, %c0_i32 : i32, i32, i32
  }
  func.func @transform_2(%arg0: i32, %arg1: i32) -> (i32, i32, i32) {
    %c0_i32 = arith.constant 0 : i32
    %c0_i32_0 = arith.constant 0 : i32
    return %arg0, %c0_i32, %arg1 : i32, i32, i32
  }
  func.func @transform_3(%arg0: i32, %arg1: i32) -> (i32, i32, i32) {
    %c0_i32 = arith.constant 0 : i32
    %c0_i32_0 = arith.constant 0 : i32
    %c0_i32_1 = arith.constant 0 : i32
    return %arg0, %c0_i32, %c0_i32_0 : i32, i32, i32
  }
  func.func @transform_4(%arg0: i32, %arg1: i32) -> (i32, i32) {
    %c0_i32 = arith.constant 0 : i32
    %c0_i32_0 = arith.constant 0 : i32
    return %c0_i32, %arg1 : i32, i32
  }
  func.func @transform_5(%arg0: i32, %arg1: i32) -> (i32, i32, i32) {
    %c0_i32 = arith.constant 0 : i32
    %c0_i32_0 = arith.constant 0 : i32
    return %arg0, %c0_i32, %arg1 : i32, i32, i32
  }
  func.func @transform_6(%arg0: i32, %arg1: i32) -> (i32, i32, i32) {
    %c0_i32 = arith.constant 0 : i32
    %c0_i32_0 = arith.constant 0 : i32
    return %arg0, %c0_i32, %arg1 : i32, i32, i32
  }
  func.func @transform_7(%arg0: i32, %arg1: i32) -> (i32, i32, i32) {
    %c0_i32 = arith.constant 0 : i32
    %c0_i32_0 = arith.constant 0 : i32
    return %arg0, %c0_i32, %arg1 : i32, i32, i32
  }
}

</mosaic_0001>

<bundles_post_ra>
// kernel: task_aligned_assigner.1
= control target key start
LH: loop header
LB: loop body
LE: loop exit
PB: predicated region body
PF: predicated region fallthrough
CT: control target
= control target key end

     0   :  { %s1195_s24 = smov 0   ;;  %s1197_s25 = smov 0   ;;  %s1335_s0 = inlined_call_operand.vmem [shape: s32[2,8,1], index: 0, kind: input, shape index: {}]   ;;  %s1336_s1 = inlined_call_operand.vmem [shape: f32[2,256,20], index: 1, kind: input, shape index: {}]   ;;  %s1337_s2 = inlined_call_operand.vmem [shape: f32[2,4,256], index: 2, kind: input, shape index: {}]   ;;  %s1338_s3 = inlined_call_operand.vmem [shape: f32[2,8,4], index: 3, kind: input, shape index: {}]   ;;  %s1339_s4 = inlined_call_operand.vmem [shape: f32[2,256], index: 4, kind: input, shape index: {}]   ;;  %s1340_s5 = inlined_call_operand.vmem [shape: bf16[2,8,256], index: 5, kind: output, shape index: {0}]   ;;  %s1341_s6 = inlined_call_operand.vmem [shape: f32[2,8,256], index: 6, kind: output, shape index: {1}]   ;;  %s1342_s7 = inlined_call_operand.vmem [shape: s8[2,8,256], index: 7, kind: output, shape index: {2}]  }
   0x1   :  { %s1199_s26 = smov 0   ;;  %s1201_s27 = smov 0  }
   0x2   :  { %s1203_s28 = smov 0  }
   0x3 LB: > { %s27_s29 = sadd.s32 1, %s1136_s26  ;;  %s30_s30 = sadd.s32 1, %s1140_s27  ;;  %s1144_s28 = sphi %s1203_s28, %s18_s28   ;;  %s1140_s27 = sphi %s1201_s27, %s1348_s27   ;;  %s1136_s26 = sphi %s1199_s26, %s1347_s26   ;;  %s1132_s25 = sphi %s1197_s25, %s1346_s25   ;;  %s1128_s24 = sphi %s1195_s24, %s1345_s24  }
   0x4   : > { %p28_p0 = scmp.ge.s32.totalorder %s27_s29, 2  ;;  %p930_p1 = scmp.ge.s32.totalorder %s1144_s28, 1 }
   0x5   : > { %p309_p2 = scmp.lt.s32.totalorder %s1144_s28, 5 }
   0x6   : > { %s1350_s29 = smov (%p28_p0, %s27_s29), 0  ;;  %s1352_s30 = smov (!%p28_p0, %s30_s30), %s1140_s27 }
   0x7   : > { %p310_p3 = pnand %p930_p1, %p309_p2  ;;  %p32_p4 = scmp.ge.s32.totalorder %s1352_s30, 2 }
   0x8   : > { %p384_p5 = scmp.lt.s32.totalorder (!%p310_p3), %s1132_s25, 1  ;;  %s932_s8 = sshll.u32 (!%p310_p3), %s1128_s24, 4  ;;  %v1146_v0 = vmov (!%p310_p3), 0   ;;  %v1147_v1 = vmov (!%p310_p3), 0.0|0.0   ;;  %vm468_vm0 = vcmask (!%p310_p3), 162816   ;;  %vm1148_vm2 = vmmov (!%p310_p3), 0  }
   0x9   : > { %s1354_s30 = smov (%p32_p4, %s1352_s30), 0  ;;  %313 = sbr.rel (%p310_p3) target bundleno = 431 (0x1af), region = 40 }
   0xa   : > { %1098 = vset.pattern.permute.xlu0 (!%p310_p3), %v1146_v0  ;;  %p391_p6 = scmp.lt.s32.totalorder (!%p310_p3), %s932_s8, 31  ;;  %1017 = vmatprep.subr.bf16.mxu0 (!%p310_p3), %v1147_v1  ;;  %vm1247_vm1 = vmpackc.low (!%p310_p3), %vm468_vm0, %vm468_vm0  ;;  %v1149_v7 = vmov (!%p310_p3), 0.0   ;;  %s1150_s22 = smov (!%p310_p3), 2   ;;  %v1151_v15 = vmov (!%p310_p3), 1   ;;  %v1152_v18 = vmov (!%p310_p3), 2   ;;  %v460_v32 = vlaneseq (!%p310_p3) }
   0xb   : > { %1099 = vset.pattern.permute.xlu1 (!%p310_p3), %v1146_v0  ;;  %1014 = vmatprep.mubr.msk.f32.mxu0 (!%p310_p3), %vm1148_vm2, %v1149_v7  ;;  %s1153_s23 = smov (!%p310_p3), 127   ;;  %v1154_v39 = vmov (!%p310_p3), 3   ;;  %p400_p7 = scmp.lt.s32.totalorder (!%p310_p3), %s1128_s24, 1 }
   0xc   : > { %v461_v33 = vand.u32 (!%p310_p3), 127, %v460_v32  ;;  %v627_v40 = vshrl.u32 (!%p310_p3), %v460_v32, 7 }
   0xe   : > { %v633_v41 = vsub.s32 (!%p310_p3), 0, %v627_v40  ;;  %v628_v42 = vsub.s32 (!%p310_p3), 2, %v627_v40  ;;  %v640_v43 = vsub.s32 (!%p310_p3), 3, %v627_v40  ;;  %v645_v44 = vsub.s32 (!%p310_p3), 1, %v627_v40 }
  0x10   : > { %s1356_s25 = smov (!%p384_p5, %s1132_s25), 1  ;;  %s1358_s8 = smov (!%p391_p6, %s932_s8), 31 }
  0x11   : > { %s931_s9 = sshll.u32 %s1356_s25, 3  ;;  %s933_s10 = sshll.u32 %s1356_s25, 5 }
  0x12   : > { %s387_s13 = scalar_lea.vmem %s1335_s0, %s931_s9  ;;  %s394_s14 = sadd.s32 %s933_s10, %s1358_s8 }
  0x13   : > { %s934_s15 = sshll.u32 %s394_s14, 3  ;;  %s409_s18 = scalar_lea.vmem %s1338_s3, %s931_s9  ;;  %v440_v2 = vld [vmem:[%s387_s13] sm:$0xff] }
  0x14   : > { %s1243_s21 = scalar_lea.vmem %s1336_s1, %s934_s15  ;;  %463 = vperm.xlu0 %1098, %v440_v2   ;;  %v1251_v4 = vld [vmem:[%s409_s18] sm:$0xff]  ;;  %s935_s8 = sshll.u32 %s1356_s25, 1 }
  0x15   : > { %v441_v5 = vld [vmem:[%s1243_s21] sm:$0xff]  ;;  %v442_v6 = vld [vmem:[%s1243_s21 + $0x8] sm:$0xff]  ;;  %v443_v9 = vld [vmem:[%s1243_s21 + $0x10] sm:$0xff]  ;;  %s1360_s24 = smov (!%p400_p7, %s1128_s24), 1 }
  0x16   : > { %v1018_v8 = vpack.c.bf16 %v442_v6, %v441_v5  ;;  %v444_v10 = vld [vmem:[%s1243_s21 + $0x18] sm:$0xff]  ;;  %v445_v12 = vld [vmem:[%s1243_s21 + $0x20] sm:$0xff]  ;;  %v446_v13 = vld [vmem:[%s1243_s21 + $0x28] sm:$0xff]  ;;  %s1295_s9 = sadd.s32 %s935_s8, %s1360_s24  ;;  %s938_s25 = sshll.u32 %s1360_s24, 1 }
  0x17   : > { %v1022_v11 = vpack.c.bf16 %v444_v10, %v443_v9  ;;  %v1026_v14 = vpack.c.bf16 %v446_v13, %v445_v12  ;;  %v447_v16 = vld [vmem:[%s1243_s21 + $0x30] sm:$0xff]  ;;  %v448_v17 = vld [vmem:[%s1243_s21 + $0x38] sm:$0xff]  ;;  %v449_v20 = vld [vmem:[%s1243_s21 + $0x40] sm:$0xff]  ;;  %s936_s10 = sshll.u32 %s1295_s9, 2  ;;  %s413_s16 = scalar_lea.vmem %s1339_s4, %s938_s25 }
  0x18   : > { %591 = vrot.lane.b32.xlu0 %v1251_v4, %s1150_s22  ;;  %1020 = vmatpush3.bf16.xpose.msk.msra.mxu0 %vm1247_vm1, %v1018_v8  ;;  %v1030_v19 = vpack.c.bf16 %v448_v17, %v447_v16  ;;  %v450_v21 = vld [vmem:[%s1243_s21 + $0x48] sm:$0xff]  ;;  %v451_v23 = vld [vmem:[%s1243_s21 + $0x50] sm:$0xff]  ;;  %v452_v24 = vld [vmem:[%s1243_s21 + $0x58] sm:$0xff]  ;;  %s405_s13 = scalar_lea.vmem %s1337_s2, %s936_s10  ;;  %s944_s24 = sshll.u32 %s1295_s9, 1 }
  0x19   : > { %1021 = vmatprep.subr.bf16.mxu0 %v1147_v1  ;;  %1100 = vset.pattern.permute.xlu0 %v1151_v15  ;;  %v1034_v22 = vpack.c.bf16 %v450_v21, %v449_v20  ;;  %v1038_v25 = vpack.c.bf16 %v452_v24, %v451_v23  ;;  %v453_v26 = vld [vmem:[%s1243_s21 + $0x60] sm:$0xff]  ;;  %v454_v27 = vld [vmem:[%s1243_s21 + $0x68] sm:$0xff]  ;;  %v455_v29 = vld [vmem:[%s1243_s21 + $0x70] sm:$0xff]  ;;  %s437_s19 = scalar_lea.vmem %s1342_s7, %s944_s24  ;;  %s942_s20 = sshll.u32 %s1295_s9, 3 }
  0x1a   : > { %v1042_v28 = vpack.c.bf16 %v454_v27, %v453_v26  ;;  %v456_v30 = vld [vmem:[%s1243_s21 + $0x78] sm:$0xff]  ;;  %v457_v45 = vld [vmem:[%s405_s13] sm:$0xf]  ;;  %s421_s12 = scalar_lea.vmem %s1340_s5, %s936_s10 }
  0x1b   : > { %v1046_v31 = vpack.c.bf16 %v456_v30, %v455_v29  ;;  %v634_v46 = vrot.slane %v457_v45, %v633_v41  ;;  %v629_v47 = vrot.slane %v457_v45, %v628_v42  ;;  %v641_v48 = vrot.slane %v457_v45, %v640_v43  ;;  %v459_v58 = vld [vmem:[%s413_s16] sm:$0x3] }
  0x1c   : > { %606 = vperm.xlu0 %1100, %v1251_v4   ;;  %v646_v49 = vrot.slane %v457_v45, %v645_v44  ;;  %v618_v50 = vrot.slane %v457_v45, 6  ;;  %v672_v61 = vrot.slane %v459_v58, %v633_v41  ;;  %v677_v62 = vrot.slane %v459_v58, %v645_v44 }
  0x1e   : > { %v620_v51 = vsub.f32 %v457_v45, %v618_v50 }
  0x20   : > { %1024 = vmatpush3.bf16.xpose.msk.msra.mxu0 %vm1247_vm1, %v1022_v11  ;;  %1103 = vset.pattern.permute.xlu0 %v1152_v18  ;;  %v621_v52 = vmax.f32 %v620_v51, 0.0 }
  0x21   : > { %1025 = vmatprep.subr.bf16.mxu0 %v1147_v1 }
  0x22   : > { %v623_v53 = vrot.slane %v621_v52, 1 }
  0x24   : > { %v625_v54 = vmul.f32 %v623_v53, %v621_v52 }
  0x26   : > { %v659_v55 = vrot.slane %v625_v54, %v628_v42 }
  0x28   : > { %1028 = vmatpush3.bf16.xpose.msk.msra.mxu0 %vm1247_vm1, %v1026_v14 }
  0x29   : > { %1029 = vmatprep.subr.bf16.mxu0 %v1147_v1 }
  0x30   : > { %1032 = vmatpush3.bf16.xpose.msk.msra.mxu0 %vm1247_vm1, %v1030_v19 }
  0x31   : > { %1033 = vmatprep.subr.bf16.mxu0 %v1147_v1 }
  0x38   : > { %1036 = vmatpush3.bf16.xpose.msk.msra.mxu0 %vm1247_vm1, %v1034_v22 }
  0x39   : > { %1037 = vmatprep.subr.bf16.mxu0 %v1147_v1 }
  0x40   : > { %1040 = vmatpush3.bf16.xpose.msk.msra.mxu0 %vm1247_vm1, %v1038_v25 }
  0x41   : > { %1041 = vmatprep.subr.bf16.mxu0 %v1147_v1 }
  0x48   : > { %1044 = vmatpush3.bf16.xpose.msk.msra.mxu0 %vm1247_vm1, %v1042_v28 }
  0x49   : > { %1045 = vmatprep.subr.bf16.mxu0 %v1147_v1 }
  0x50   : > { %1048 = vmatpush3.bf16.xpose.msk.msra.mxu0 %vm1247_vm1, %v1046_v31 }
  0x93   : > { %v464_v34 = vpop.permute.xlu0 %463 }
  0x94   : > { %vm465_vm3 = vcmp.eq.s32.totalorder %v464_v34, %v461_v33 }
  0x95   : > { %v945_v35 = vsel %vm465_vm3, 1.0, %v1149_v7 }
  0x96   : > { %1015 = vmatmul.mubr.msk.f32.vlgmr.msra.gmra.mrb[0].mxu0 %vm468_vm0, %v945_v35 }
  0x97   : > { %v592_v36 = vpop.permute.xlu0 %591 }
  0x98   : > { %v594_v37 = vsub.f32 %v1251_v4, %v592_v36 }
  0x9a   : > { %v595_v38 = vmax.f32 %v594_v37, 0.0 }
  0x9b   : > { %v607_v63 = vpop.permute.xlu0 %606 }
  0x9c   : > { %597 = vrot.lane.b32.xlu1 %v595_v38, %s1153_s23  ;;  %v647_v7 = vmax.f32 %v607_v63, %v646_v49  ;;  %s429_s23 = scalar_lea.vmem %s1341_s6, %s942_s20 }
  0xa0   : > { %602 = vperm.xlu1 %1099, %v1251_v4  }
  0xa4   : > { %1101 = vset.pattern.permute.xlu1 %v1152_v18 }
  0xa5   : > { %610 = vperm.xlu1 %1101, %v1251_v4  }
  0xa9   : > { %1102 = vset.pattern.permute.xlu1 %v1154_v39 }
  0xaa   : > { %614 = vperm.xlu1 %1102, %v1251_v4   ;;  %v678_v4 = vsub.f32 %v677_v62, %v607_v63 }
 0x10e   : > { %v598_v56 = vpop.permute.xlu1 %597 }
 0x10f   : > { %v600_v57 = vmul.f32 %v598_v56, %v595_v38 }
 0x111   : > { %653 = vperm.xlu0 %1103, %v600_v57  }
 0x11f   : > { %v603_v59 = vpop.permute.xlu1 %602 }
 0x120   : > { %v635_v60 = vmax.f32 %v603_v59, %v634_v46  ;;  %v673_v3 = vsub.f32 %v672_v61, %v603_v59 }
 0x122   : > { %v679_v11 = vmin.f32 %v673_v3, %v678_v4 }
 0x124   : > { %v611_v1 = vpop.permute.xlu1 %610 }
 0x125   : > { %v630_v2 = vmin.f32 %v611_v1, %v629_v47  ;;  %v680_v6 = vsub.f32 %v611_v1, %v672_v61 }
 0x127   : > { %v636_v5 = vsub.f32 %v630_v2, %v635_v60 }
 0x129   : > { %v615_v8 = vpop.permute.xlu1 %614  ;;  %v637_v12 = vmax.f32 %v636_v5, 0.0 }
 0x12a   : > { %v642_v9 = vmin.f32 %v615_v8, %v641_v48  ;;  %v681_v10 = vsub.f32 %v615_v8, %v677_v62 }
 0x12c   : > { %v682_v13 = vmin.f32 %v680_v6, %v681_v10  ;;  %v648_v14 = vsub.f32 %v642_v9, %v647_v7 }
 0x12e   : > { %v649_v15 = vmax.f32 %v648_v14, 0.0  ;;  %v683_v16 = vmin.f32 %v679_v11, %v682_v13 }
 0x130   : > { %vm687_vm4 = vcmp.gt.f32.partialorder %v683_v16, 1e-09  ;;  %v650_v17 = vmul.f32 %v649_v15, %v637_v12 }
 0x131   : > { %vm688_vm5 = vmpackc.low %vm687_vm4, %vm687_vm4 }
 0x132   : > { %vm689_vm6 = vmpackc.even %vm688_vm5, %vm688_vm5 }
 0x133   : > { %v690_v18 = vsel %vm689_vm6, 16843009, %v1146_v0 }
 0x134   : > { %691 = vst [vmem:[%s437_s19] sm:$0x3] %v690_v18 }
 0x169   : > { %v586_v19 = vpop.f32.mrb[0].mxu0 }
 0x16a   : > { %v1016_v20 = vpop.f32.mrb[1].mxu0 }
 0x190   : > { %v654_v21 = vpop.permute.xlu0 %653 }
 0x191   : > { %v660_v22 = vadd.f32 %v659_v55, %v654_v21 }
 0x193   : > { %v661_v23 = vsub.f32 %v660_v22, %v650_v17 }
 0x195   : > { %v662_v24 = vadd.f32 1e-09, %v661_v23 }
 0x197   : > { %1104 = vrcp.f32 %v662_v24 }
 0x1a1   : > { %v1105_v25 = vpop.eup %1104 }
 0x1a2   : > { %v664_v26 = vmul.f32 %v1105_v25, %v650_v17 }
 0x1a4   : > { %v665_v27 = vmul.f32 %v664_v26, %v664_v26  ;;  %686 = vst [vmem:[%s429_s23] sm:$0xff] %v664_v26 }
 0x1a6   : > { %v666_v28 = vmul.f32 %v665_v27, %v665_v27 }
 0x1a8   : > { %v667_v0 = vmul.f32 %v666_v28, %v665_v27 }
 0x1aa   : > { %v668_v29 = vmul.f32 %v667_v0, %v586_v19 }
 0x1ac   : > { %v684_v30 = vpack.c.bf16 %v668_v29, %v668_v29 }
 0x1ae   : > { %685 = vst [vmem:[%s421_s12] sm:$0xf] %v684_v30 }
 0x1af PF: > { %s18_s28 = sadd.s32 1, %s1144_s28   ;;  %s1345_s24 = smov %s1136_s26 }
 0x1b0   : > { %p15_p8 = scmp.ge.s32.totalorder %s18_s28, 6   ;;  %s1346_s25 = smov %s1140_s27 }
 0x1b1   : > { %s1347_s26 = smov %s1350_s29  ;;  %s1348_s27 = smov %s1354_s30 }
 0x1b2   :  { %17 = sbr.rel (!%p15_p8) target bundleno = 3 (0x3), region = 106 }

</bundles_post_ra>
